<compile_context>
chip_gen: v7x
topology: tpu7x:2x2x1
jax: 0.10.0
libtpu: 0.0.40
codegen_flags: <defaults>
</compile_context>

<pallas_src>
import numpy as np
import jax
import jax.numpy as jnp
from jax.experimental import pallas as pl
from jax.experimental.pallas import tpu as pltpu

# ----------------------- static system configuration -----------------------
B = 2                    # sys_parameters.batch_size_eval_small
NUM_RX = 1
NUM_RX_ANT = 2           # sys_parameters.num_rx_antennas
NUM_TX = 2               # sys_parameters.max_num_tx
NUM_STREAMS = 1
T = 8                    # num_ofdm_symbols
FFT = 36                 # fft_size
NULLED_SC = np.array([0, 1, 34, 35])                 # guard carriers (nulled)
EFF_SC = np.setdiff1d(np.arange(FFT), NULLED_SC)     # effective subcarriers
F = EFF_SC.size                                      # 32
PILOT_SYMS = np.array([2, 5])                        # pilot-bearing OFDM symbols
NP_PER_TX = PILOT_SYMS.size * F                      # num_pilot_symbols = 64
R = 4                                                # reduction
PG = NP_PER_TX // R                                  # pilots per reduced group = 16
F_R = F // R                                         # subcarriers per reduced group = 8
OUT = T * F_R                                        # interpolated grid pts / group = 64
M = NUM_RX * NUM_RX_ANT                              # merged rx dims
NROWS = R * B * M * NUM_TX * NUM_STREAMS             # 32
K_PACK = 3 * PG                                      # 48  (packed contraction depth)
N_PACK = 4 * OUT                                     # 256 (packed output lanes)


# ----------------------- deterministic synthetic parameters ----------------
def make_params():
    # flat pilot indices into the flattened [T*F] effective grid, per (tx, stream)
    per_tx = (PILOT_SYMS[:, None] * F + np.arange(F)[None, :]).reshape(-1)   # [NP_PER_TX]
    pilot_ind = np.tile(per_tx, NUM_TX * NUM_STREAMS).astype(np.int32)       # [NTX*NS*NP]

    # deterministic QPSK-like pilot symbols (non-unit magnitude to exercise /|p|^2)
    k = np.arange(NUM_TX * NUM_STREAMS * NP_PER_TX)
    phase = 2.0 * np.pi * ((3 * k + 1) % 8) / 8.0
    pilots = (np.sqrt(2.0) * (np.cos(phase) + 1j * np.sin(phase))).astype(np.complex64)

    # synthetic complex LMMSE interpolation matrix  W: [OUT, PG]
    o = np.arange(OUT, dtype=np.float64)[:, None]
    p = np.arange(PG, dtype=np.float64)[None, :]
    w_re = np.cos(2.0 * np.pi * o * (p + 1.0) / (OUT + PG)) / PG
    w_im = np.sin(2.0 * np.pi * (o + 1.0) * p / (OUT + PG)) / PG
    # error-variance propagation matrix (may produce negatives -> clamp matters)
    a_mat = (w_re * w_re - 0.25 * w_im * w_im) * PG

    # --- precomputed constants for the optimized Pallas path -----------------
    # (a) gather index: raw y.reshape(-1) -> grouped pilot rows [NROWS, PG]
    rr, bb, mm, tt, ss = np.meshgrid(np.arange(R), np.arange(B), np.arange(M),
                                     np.arange(NUM_TX), np.arange(NUM_STREAMS),
                                     indexing="ij")
    rows_r = rr.reshape(NROWS)                                   # reduction group per row
    rows_base = ((bb * M + mm) * T).reshape(NROWS)               # (b, ant) offset in symbols
    cols_sym = np.repeat(PILOT_SYMS, F_R)                        # [PG] OFDM symbol per col
    cols_w = np.tile(np.arange(F_R), PILOT_SYMS.size)            # [PG] sc-in-group per col
    sc = EFF_SC[rows_r[:, None] * F_R + cols_w[None, :]]         # [NROWS, PG] subcarrier
    gather_idx = ((rows_base[:, None] + cols_sym[None, :]) * FFT + sc).astype(np.int32)

    # (b) pilot constants in the same grouped row layout:
    #     c = conj(p)/|p|^2  (so h_LS = y * c)  and  1/|p|^2  (err var = no/|p|^2)
    pil = pilots.reshape(NUM_TX, NUM_STREAMS, 2, R, F_R)
    p_g = np.transpose(pil, (3, 0, 1, 2, 4)).reshape(R, NUM_TX, NUM_STREAMS, PG)
    p_rows = np.broadcast_to(p_g[:, None, None],
                             (R, B, M, NUM_TX, NUM_STREAMS, PG)).reshape(NROWS, PG)
    inv_p2 = 1.0 / (np.abs(p_rows) ** 2)
    cc_re = p_rows.real * inv_p2
    cc_im = -p_rows.imag * inv_p2
    pc = np.concatenate([cc_re, cc_im, inv_p2], axis=1).astype(np.float32)   # [32, 48]

    # (c) block-packed RHS for the single fused MXU matmul: [48, 256]
    wt_re = w_re.T.astype(np.float32)        # [PG, OUT]
    wt_im = w_im.T.astype(np.float32)
    at = a_mat.T.astype(np.float32)
    Z = np.zeros((PG, OUT), np.float32)
    w_packed = np.block([[wt_re,  wt_im, Z,  Z],
                         [-wt_im, wt_re, Z,  Z],
                         [Z,      Z,     at, Z]]).astype(np.float32)         # [48, 256]

    return dict(
        # raw parameters (used by the pure-JAX reference)
        pilot_ind=jnp.asarray(pilot_ind),
        pilots=jnp.asarray(pilots),
        w_re=jnp.asarray(w_re, dtype=jnp.float32),
        w_im=jnp.asarray(w_im, dtype=jnp.float32),
        a_mat=jnp.asarray(a_mat, dtype=jnp.float32),
        eff_sc=jnp.asarray(EFF_SC),
        # packed constants for the Pallas hot path
        gather_idx=jnp.asarray(gather_idx),
        pc=jnp.asarray(pc),
        w_packed=jnp.asarray(w_packed),
    )


# ----------------------- Pallas kernel (hot path) ---------------------------
def _lmse_kernel(no_ref, yin_ref, pc_ref, w_ref, out_ref):
    # yin: [NROWS, 2*PG] = [y_re | y_im]
    # pc : [NROWS, 3*PG] = [Re(conj(p)/|p|^2) | Im(conj(p)/|p|^2) | 1/|p|^2]
    # w  : [3*PG, 4*OUT] block-packed interpolation / err-var matrix
    no = no_ref[0]
    y_re = yin_ref[:, 0:PG]
    y_im = yin_ref[:, PG:2 * PG]
    cc_re = pc_ref[:, 0:PG]
    cc_im = pc_ref[:, PG:2 * PG]
    inv_p2 = pc_ref[:, 2 * PG:3 * PG]

    # LS estimate at pilot locations: h = y * conj(p)/|p|^2   (pure VALU)
    h_re = y_re * cc_re - y_im * cc_im
    h_im = y_re * cc_im + y_im * cc_re
    ev_p = no * inv_p2                                   # err var at pilots

    # single fused real matmul on the MXU:
    #   [h_re|h_im|ev_p] @ W_packed = [h_re_out | h_im_out | ev_out | 0]
    lhs = jnp.concatenate([h_re, h_im, ev_p], axis=1)    # [NROWS, 48]
    res = jnp.dot(lhs, w_ref[...], preferred_element_type=jnp.float32)  # [NROWS, 256]

    # lane-dense stores (both at 128-lane tile boundaries -> unmasked vst);
    # clamp(min=0) only on the error-variance block (cols 128:191; 192:255 are 0).
    out_ref[:, 0:2 * OUT] = res[:, 0:2 * OUT]
    out_ref[:, 2 * OUT:N_PACK] = jnp.maximum(res[:, 2 * OUT:N_PACK], 0.0)


def _run_kernel(no_arr, yin, pc, w_packed):
    smem = pl.BlockSpec(memory_space=pltpu.MemorySpace.SMEM)
    vmem = pl.BlockSpec(memory_space=pltpu.MemorySpace.VMEM)
    return pl.pallas_call(
        _lmse_kernel,
        out_shape=jax.ShapeDtypeStruct((NROWS, N_PACK), jnp.float32),
        in_specs=[smem, vmem, vmem, vmem],
        out_specs=vmem,
    )(no_arr, yin, pc, w_packed)


# ----------------------- glue (minimal, fully fused under jit) --------------
def _ungroup_grid_axis(x7):
    # x7: [R, B, M, NTX, NS, T, F_R]  ->  [1, B, M, NTX, NS, T, F]
    # mirrors h_hat8 .. h_hat10 in the PyTorch forward
    x8 = x7.reshape(R, 1, B, M, NUM_TX, NUM_STREAMS, T, F_R)
    x9 = jnp.transpose(x8, (1, 2, 3, 4, 5, 6, 0, 7))
    return x9.reshape(1, B, M, NUM_TX, NUM_STREAMS, T, F)


@jax.jit
def low_complexity_lmse_forward(y, no, params):
    # y: [B, NUM_RX, NUM_RX_ANT, T, FFT] complex64 ; no: scalar noise power
    # 1) single fused gather: raw grid -> grouped pilot rows [NROWS, PG]
    y_rows = jnp.take(y.reshape(-1), params['gather_idx'], axis=0)
    # 2) lane-pack re/im into one dense f32 input tile [NROWS, 2*PG]
    yin = jnp.concatenate([jnp.real(y_rows), jnp.imag(y_rows)],
                          axis=1).astype(jnp.float32)
    no_arr = jnp.reshape(jnp.asarray(no, dtype=jnp.float32), (1,))

    out = _run_kernel(no_arr, yin, params['pc'], params['w_packed'])   # [NROWS, 256]

    h_re = out[:, 0:OUT]
    h_im = out[:, OUT:2 * OUT]
    ev = out[:, 2 * OUT:3 * OUT]

    h7 = (h_re + 1j * h_im).astype(jnp.complex64).reshape(
        R, B, M, NUM_TX, NUM_STREAMS, T, F_R)
    e7 = ev.reshape(R, B, M, NUM_TX, NUM_STREAMS, T, F_R)

    # 3) reassemble the reduced groups along frequency
    return _ungroup_grid_axis(h7), _ungroup_grid_axis(e7)


# ----------------------- pure-JAX reference (for validation) ----------------
def _group_pilot_axis(x):
    # x: [B, num_rx, num_rx_ant, NTX, NS, NP]  ->  [R, B, M, NTX, NS, NP//R]
    x = x.reshape(B, NUM_RX, NUM_RX_ANT, NUM_TX, NUM_STREAMS, 2, R, NP_PER_TX // (2 * R))
    x = jnp.transpose(x, (6, 0, 1, 2, 3, 4, 5, 7))
    x = x.reshape(R, B, NUM_RX, NUM_RX_ANT, NUM_TX, NUM_STREAMS, NP_PER_TX // R)
    return x.reshape(R, B, M, NUM_TX, NUM_STREAMS, NP_PER_TX // R)


def reference_forward(y, no, params):
    y_eff = y[..., params['eff_sc']]
    y_eff_flat = y_eff.reshape(*y_eff.shape[:-2], T * F)
    y_p = jnp.take(y_eff_flat, params['pilot_ind'], axis=-1)
    y_p = y_p.reshape(B, NUM_RX, NUM_RX_ANT, NUM_TX, NUM_STREAMS, NP_PER_TX)
    y_g = _group_pilot_axis(y_p)
    p_flat = params['pilots'].reshape(NUM_TX, NUM_STREAMS, NP_PER_TX)
    p_flat = p_flat.reshape(NUM_TX, NUM_STREAMS, 2, R, NP_PER_TX // (2 * R))
    p_g = jnp.transpose(p_flat, (3, 0, 1, 2, 4)).reshape(R, NUM_TX, NUM_STREAMS, PG)
    p_g = jnp.broadcast_to(p_g[:, None, None], (R, B, M, NUM_TX, NUM_STREAMS, PG))

    h_p = (y_g / p_g).reshape(NROWS, PG)
    ev_p = (no / jnp.abs(p_g.reshape(NROWS, PG)) ** 2).astype(jnp.float32)

    w_c = (params['w_re'] + 1j * params['w_im']).astype(jnp.complex64)   # [OUT, PG]
    h_out = h_p @ w_c.T
    e_out = jnp.maximum(ev_p @ params['a_mat'].T, 0.0)

    h7 = h_out.reshape(R, B, M, NUM_TX, NUM_STREAMS, T, F_R)
    e7 = e_out.reshape(R, B, M, NUM_TX, NUM_STREAMS, T, F_R)
    return _ungroup_grid_axis(h7), _ungroup_grid_axis(e7)


# ----------------------- main -----------------------------------------------
if __name__ == "__main__":
    params = make_params()
    key = jax.random.PRNGKey(0)
    k1, k2 = jax.random.split(key)
    y = (jax.random.normal(k1, (B, NUM_RX, NUM_RX_ANT, T, FFT), dtype=jnp.float32)
         + 1j * jax.random.normal(k2, (B, NUM_RX, NUM_RX_ANT, T, FFT), dtype=jnp.float32)
         ).astype(jnp.complex64)
    no = 0.1

    h_hat, err_var = low_complexity_lmse_forward(y, no, params)
    jax.block_until_ready((h_hat, err_var))

    h_ref, e_ref = reference_forward(y, no, params)
    np.testing.assert_allclose(np.asarray(h_hat), np.asarray(h_ref), rtol=2e-3, atol=2e-3)
    np.testing.assert_allclose(np.asarray(err_var), np.asarray(e_ref), rtol=2e-3, atol=2e-3)

    assert h_hat.shape == (1, B, M, NUM_TX, NUM_STREAMS, T, F)
    assert err_var.shape == (1, B, M, NUM_TX, NUM_STREAMS, T, F)
    print("KERNEL_OK")
</pallas_src>

<mosaic_0001>
module attributes {stable_mosaic.version = 11 : i64} {
  func.func @_lmse_kernel(%arg0: memref<1xf32, #tpu.memory_space<smem>>, %arg1: memref<32x32xf32, #tpu.memory_space<vmem>>, %arg2: memref<32x48xf32, #tpu.memory_space<vmem>>, %arg3: memref<48x256xf32, #tpu.memory_space<vmem>>, %arg4: memref<32x256xf32, #tpu.memory_space<vmem>>) attributes {dimension_semantics = [], scalar_prefetch = 0 : i64, scratch_operands = 0 : i64, tpu.core_type = #tpu.core_type<tc>} {
    %c0 = arith.constant 0 : index
    %0 = memref.load %arg0[%c0] : memref<1xf32, #tpu.memory_space<smem>>
    %c0_0 = arith.constant 0 : index
    %c0_1 = arith.constant 0 : index
    %1 = vector.load %arg1[%c0_0, %c0_1] : memref<32x32xf32, #tpu.memory_space<vmem>>, vector<32x16xf32>
    %c0_2 = arith.constant 0 : index
    %c16 = arith.constant 16 : index
    %2 = vector.load %arg1[%c0_2, %c16] : memref<32x32xf32, #tpu.memory_space<vmem>>, vector<32x16xf32>
    %c0_3 = arith.constant 0 : index
    %c0_4 = arith.constant 0 : index
    %3 = vector.load %arg2[%c0_3, %c0_4] : memref<32x48xf32, #tpu.memory_space<vmem>>, vector<32x16xf32>
    %c0_5 = arith.constant 0 : index
    %c16_6 = arith.constant 16 : index
    %4 = vector.load %arg2[%c0_5, %c16_6] : memref<32x48xf32, #tpu.memory_space<vmem>>, vector<32x16xf32>
    %c0_7 = arith.constant 0 : index
    %c32 = arith.constant 32 : index
    %5 = vector.load %arg2[%c0_7, %c32] : memref<32x48xf32, #tpu.memory_space<vmem>>, vector<32x16xf32>
    %6 = arith.mulf %1, %3 : vector<32x16xf32>
    %7 = arith.mulf %2, %4 : vector<32x16xf32>
    %8 = arith.subf %6, %7 : vector<32x16xf32>
    %9 = arith.mulf %1, %4 : vector<32x16xf32>
    %10 = arith.mulf %2, %3 : vector<32x16xf32>
    %11 = arith.addf %9, %10 : vector<32x16xf32>
    %12 = vector.broadcast %0 : f32 to vector<32x16xf32>
    %13 = arith.mulf %12, %5 : vector<32x16xf32>
    %14 = tpu.concatenate %8, %11, %13 in 1 : vector<32x16xf32>, vector<32x16xf32>, vector<32x16xf32> -> vector<32x48xf32>
    %c0_8 = arith.constant 0 : index
    %c0_9 = arith.constant 0 : index
    %15 = vector.load %arg3[%c0_8, %c0_9] : memref<48x256xf32, #tpu.memory_space<vmem>>, vector<48x256xf32>
    %cst = arith.constant dense<0.000000e+00> : vector<32x256xf32>
    %16 = tpu.matmul %14, %15, %cst {dimension_numbers = #tpu.dot_dimension_numbers<[1], [0], [0], [1], [0, 0, 1, 1], [], []>} : vector<32x48xf32>, vector<48x256xf32>, vector<32x256xf32> -> vector<32x256xf32>
    %17 = vector.extract_strided_slice %16 {offsets = [0, 0], sizes = [32, 128], strides = [1, 1]} : vector<32x256xf32> to vector<32x128xf32>
    %c0_10 = arith.constant 0 : index
    %c0_11 = arith.constant 0 : index
    %18 = vector.load %arg4[%c0_10, %c0_11] : memref<32x256xf32, #tpu.memory_space<vmem>>, vector<32x128xf32>
    tpu.vector_store %arg4[%c0_10, %c0_11], %17 {strides = array<i32>} : memref<32x256xf32, #tpu.memory_space<vmem>>, vector<32x128xf32>,
    %19 = vector.extract_strided_slice %16 {offsets = [0, 128], sizes = [32, 128], strides = [1, 1]} : vector<32x256xf32> to vector<32x128xf32>
    %cst_12 = arith.constant 0.000000e+00 : f32
    %20 = vector.broadcast %cst_12 : f32 to vector<32x128xf32>
    %21 = arith.maximumf %19, %20 : vector<32x128xf32>
    %c0_13 = arith.constant 0 : index
    %c128 = arith.constant 128 : index
    %22 = vector.load %arg4[%c0_13, %c128] : memref<32x256xf32, #tpu.memory_space<vmem>>, vector<32x128xf32>
    tpu.vector_store %arg4[%c0_13, %c128], %21 {strides = array<i32>} : memref<32x256xf32, #tpu.memory_space<vmem>>, vector<32x128xf32>,
    return
  }
}

</mosaic_0001>

<bundles_post_ra>
// kernel: custom-call.1
= control target key start
LH: loop header
LB: loop body
LE: loop exit
PB: predicated region body
PF: predicated region fallthrough
CT: control target
= control target key end

     0   :  { %s59_s0 = inlined_call_operand.hbm [shape: c64[2,1,2,8,36], index: 0, kind: input, shape index: {}]   ;;  %s60_s1 = inlined_call_operand.vmem [shape: f32[2,1,2,8,36], index: 1, kind: output, shape index: {}]  }
   0x1   :  { %s2_s8 = scalar_lea.hbm %s59_s0, 512 }
   0x2   :  { %3 = vsyncpa [#allocation0], 0  ;;  %s4_s11 = sshll.u32 %s60_s1, 4  ;;  %s34_s14 = scalar_lea.hbm %s59_s0, 1024  ;;  %s5_s11 = int_to_ptr.vmem [resolvable:$true] %s4_s11 }
   0x3   :  { %p11_p0 = scmp.ne.s32.totalorder %s2_s8, %s34_s14  ;;  %p13_p1 = scmp.lt.u32.totalorder %s2_s8, %s59_s0 }
   0x4   :  { %p14_p2 = scmp.lt.u32.totalorder %s34_s14, %s34_s14  ;;  %p16_p4 = scmp.lt.u32.totalorder %s34_s14, %s2_s8 }
   0x6   :  { %p15_p3 = por %p14_p2, %p13_p1 }
   0x8   :  { %p17_p5 = por %p16_p4, %p15_p3 }
   0xa   :  { %p18_p6 = pnand %p17_p5, %p11_p0 }
   0xc   :  { %21 = shalt.err (!%p18_p6)  }
   0xd   :  { %s22_s17 = scalar_lea.vmem %s5_s11, 512  ;;  %p27_p8 = scmp.lt.s32.totalorder %s5_s11, %s5_s11 }
   0xe   :  { %p23_p7 = scmp.ne.s32.totalorder %s5_s11, %s22_s17  ;;  %p28_p9 = scmp.lt.s32.totalorder %s22_s17, %s22_s17 }
  0x10   :  { %p29_p10 = por %p28_p9, %p27_p8 }
  0x12   :  { %p30_p11 = pnand %p29_p10, %p23_p7 }
  0x14   :  { %33 = shalt.err (!%p30_p11)  }
  0x15   :  { %7 = dma.hbm_to_vmem [thread:$0]  %s2_s8, 512, %s5_s11, [#allocation0] }
  0x16   :  { %35 = dma.done.wait [#allocation0], 512  }
  0x17   :  { %36 = vsyncadd [#allocation0], 4294966784 }
  0x18   :  { %9 = vsyncpa [#allocation0], 1 }

// kernel: custom-call
= control target key start
LH: loop header
LB: loop body
LE: loop exit
PB: predicated region body
PF: predicated region fallthrough
CT: control target
= control target key end

     0   :  { %2 = vsyncpa [#allocation0], 0  ;;  %s61_s0 = inlined_call_operand.hbm [shape: c64[2,1,2,8,36], index: 0, kind: input, shape index: {}]   ;;  %s62_s1 = inlined_call_operand.vmem [shape: f32[2,1,2,8,36], index: 1, kind: output, shape index: {}]  }
   0x1   :  { %s3_s8 = sshll.u32 %s62_s1, 4  ;;  %s9_s11 = scalar_lea.hbm %s61_s0, 512  ;;  %s4_s8 = int_to_ptr.vmem [resolvable:$true] %s3_s8 }
   0x2   :  { %p10_p0 = scmp.ne.s32.totalorder %s61_s0, %s9_s11  ;;  %s11_s16 = scalar_lea.hbm %s61_s0, 1024 }
   0x3   :  { %p12_p1 = scmp.lt.u32.totalorder %s11_s16, %s9_s11  ;;  %p13_p2 = scmp.lt.u32.totalorder %s9_s11, %s61_s0 }
   0x5   :  { %p14_p3 = por %p13_p2, %p12_p1 }
   0x7   :  { %p15_p4 = pnand %p14_p3, %p10_p0 }
   0x9   :  { %18 = shalt.err (!%p15_p4)  }
   0xa   :  { %s19_s1 = scalar_lea.vmem %s4_s8, 512  ;;  %p24_p6 = scmp.lt.s32.totalorder %s4_s8, %s4_s8 }
   0xb   :  { %p20_p5 = scmp.ne.s32.totalorder %s4_s8, %s19_s1  ;;  %p25_p7 = scmp.lt.s32.totalorder %s19_s1, %s19_s1 }
   0xd   :  { %p26_p8 = por %p25_p7, %p24_p6 }
   0xf   :  { %p27_p9 = pnand %p26_p8, %p20_p5 }
  0x11   :  { %30 = shalt.err (!%p27_p9)  }
  0x12   :  { %6 = dma.hbm_to_vmem [thread:$0]  %s61_s0, 512, %s4_s8, [#allocation0] }
  0x13   :  { %31 = dma.done.wait [#allocation0], 512  }
  0x14   :  { %32 = vsyncadd [#allocation0], 4294966784 }
  0x15   :  { %8 = vsyncpa [#allocation0], 1 }

// kernel: custom-call.2
= control target key start
LH: loop header
LB: loop body
LE: loop exit
PB: predicated region body
PF: predicated region fallthrough
CT: control target
= control target key end

     0   :  { %s126_s0 = inlined_call_operand.vmem [shape: f32[1,2,2,2,1,8,32], index: 0, kind: input, shape index: {}]   ;;  %s127_s1 = inlined_call_operand.vmem [shape: f32[1,2,2,2,1,8,32], index: 1, kind: input, shape index: {}]   ;;  %s128_s2 = inlined_call_operand.hbm [shape: c64[1,2,2,2,1,8,32], index: 2, kind: output, shape index: {}]  }
   0x1   :  { %s87_s11 = scalar_lea.hbm %s128_s2, 1024 }
   0x2   :  { %4 = vsyncpa [#allocation0], 0  ;;  %s5_s14 = sshll.u32 %s126_s0, 4  ;;  %s6_s14 = int_to_ptr.vmem [resolvable:$true] %s5_s14 }
   0x3   :  { %s18_s15 = scalar_lea.vmem %s6_s14, 1024  ;;  %p23_p1 = scmp.lt.s32.totalorder %s6_s14, %s6_s14 }
   0x4   :  { %p19_p0 = scmp.ne.s32.totalorder %s6_s14, %s18_s15  ;;  %p24_p2 = scmp.lt.s32.totalorder %s18_s15, %s18_s15 }
   0x6   :  { %p25_p3 = por %p24_p2, %p23_p1 }
   0x8   :  { %p26_p4 = pnand %p25_p3, %p19_p0 }
   0xa   :  { %29 = shalt.err (!%p26_p4)  }
   0xb   :  { %p31_p5 = scmp.ne.s32.totalorder %s128_s2, %s87_s11  ;;  %s32_s0 = scalar_lea.hbm %s128_s2, 2048 }
   0xc   :  { %p33_p6 = scmp.lt.u32.totalorder %s32_s0, %s87_s11  ;;  %p34_p7 = scmp.lt.u32.totalorder %s87_s11, %s128_s2 }
   0xe   :  { %p35_p8 = por %p34_p7, %p33_p6 }
  0x10   :  { %p36_p9 = pnand %p35_p8, %p31_p5 }
  0x12   :  { %39 = shalt.err (!%p36_p9)  }
  0x13   :  { %8 = dma.vmem_to_hbm [thread:$0]  %s6_s14, 1024, %s128_s2, [#allocation0] }
  0x14   :  { %65 = dma.done.wait [#allocation0], 1024  }
  0x15   :  { %66 = vsyncadd [#allocation0], 4294966272 }
  0x16   :  { %10 = vsyncpa [#allocation0], 1 }
  0x17   :  { %11 = vsyncpa [#allocation1], 0  ;;  %s12_s28 = sshll.u32 %s127_s1, 4  ;;  %s13_s28 = int_to_ptr.vmem [resolvable:$true] %s12_s28 }
  0x18   :  { %s40_s29 = scalar_lea.vmem %s13_s28, 1024  ;;  %p45_p11 = scmp.lt.s32.totalorder %s13_s28, %s13_s28 }
  0x19   :  { %p41_p10 = scmp.ne.s32.totalorder %s13_s28, %s40_s29  ;;  %p46_p12 = scmp.lt.s32.totalorder %s40_s29, %s40_s29 }
  0x1b   :  { %p47_p13 = por %p46_p12, %p45_p11 }
  0x1d   :  { %p48_p0 = pnand %p47_p13, %p41_p10 }
  0x1f   :  { %51 = shalt.err (!%p48_p0)  }
  0x20   :  { %p53_p1 = scmp.ne.s32.totalorder %s87_s11, %s32_s0  ;;  %p56_p2 = scmp.lt.u32.totalorder %s32_s0, %s32_s0 }
  0x22   :  { %p57_p3 = por %p56_p2, %p34_p7 }
  0x24   :  { %p59_p4 = por %p57_p3, %p33_p6 }
  0x26   :  { %p60_p5 = pnand %p59_p4, %p53_p1 }
  0x28   :  { %63 = shalt.err (!%p60_p5)  }
  0x29   :  { %15 = dma.vmem_to_hbm [thread:$0]  %s13_s28, 1024, %s87_s11, [#allocation1] }
  0x2a   :  { %67 = dma.done.wait [#allocation1], 1024  }
  0x2b   :  { %68 = vsyncadd [#allocation1], 4294966272 }
  0x2c   :  { %17 = vsyncpa [#allocation1], 1 }

// kernel: low_complexity_lmse_forward.1
= control target key start
LH: loop header
LB: loop body
LE: loop exit
PB: predicated region body
PF: predicated region fallthrough
CT: control target
= control target key end

     0   :  { %s293_s19 = smov 16   ;;  %s294_s24 = smov 112   ;;  %v295_v39 = vmov 0.0   ;;  %vm128_vm0 = vcmask 130048   ;;  %vm133_vm1 = vcmask 261120   ;;  %vm150_vm2 = vcmask 392192   ;;  %s469_s2 = inlined_call_operand.vmem [shape: f32[32,48], index: 2, kind: input, shape index: {}]   ;;  %s470_s1 = inlined_call_operand.vmem [shape: f32[32,32], index: 1, kind: input, shape index: {}]   ;;  %s471_s3 = inlined_call_operand.vmem [shape: f32[48,256], index: 3, kind: input, shape index: {}]   ;;  %s472_s0 = inlined_call_operand.<no memory space> [shape: f32[1], index: 0, kind: input, shape index: {}]   ;;  %s473_s4 = inlined_call_operand.vmem [shape: f32[32,256], index: 4, kind: output, shape index: {}]  }
   0x1   :  { %v324_v0 = vld [vmem:[%s469_s2] sm:$0xff]  ;;  %v329_v1 = vld [vmem:[%s469_s2 + $0x8] sm:$0xff]  ;;  %v338_v2 = vld [vmem:[%s469_s2 + $0x10] sm:$0xff]  ;;  %227 = vmatprep.mubr.f32.mxu0 %v295_v39  ;;  %239 = vmatprep.mubr.f32.mxu1 %v295_v39  ;;  %v107_v58 = vstv %s472_s0 }
   0x2   :  { %71 = vrot.lane.b32.xlu0 %v324_v0, %s293_s19  ;;  %73 = vrot.lane.b32.xlu1 %v329_v1, %s293_s19  ;;  %v343_v3 = vld [vmem:[%s469_s2 + $0x18] sm:$0xff]  ;;  %v19_v4 = vld [vmem:[%s470_s1] sm:$0xff]  ;;  %v108_v59 = vmul.f32 %v107_v58, %v324_v0 }
   0x3   :  { %v363_v7 = vld [vmem:[%s470_s1 + $0x8] sm:$0xff]  ;;  %v21_v8 = vld [vmem:[%s470_s1 + $0x10] sm:$0xff]  ;;  %v141_v11 = vld [vmem:[%s471_s3 + $0x18] sm:$0xff]  ;;  %v27_v33 = vmul.f32 %v324_v0, %v19_v4 }
   0x4   :  { %v139_v10 = vld [vmem:[%s471_s3 + $0x8] sm:$0xff]  ;;  %v138_v12 = vld [vmem:[%s471_s3] sm:$0xff]  ;;  %v140_v14 = vld [vmem:[%s471_s3 + $0x10] sm:$0xff]  ;;  %v29_v35 = vmul.f32 %v338_v2, %v21_v8  ;;  %v28_v36 = vmul.f32 %v329_v1, %v363_v7 }
   0x5   :  { %v272_v13 = vpack.c.bf16 %v141_v11, %v139_v10  ;;  %v143_v15 = vld [vmem:[%s471_s3 + $0x28] sm:$0xff]  ;;  %v145_v16 = vld [vmem:[%s471_s3 + $0x38] sm:$0xff]  ;;  %v274_v18 = vpack.c.bf16 %v140_v14, %v138_v12  ;;  %v142_v20 = vld [vmem:[%s471_s3 + $0x20] sm:$0xff]  ;;  %v111_v12 = vmul.f32 %v107_v58, %v343_v3 }
   0x6   :  { %75 = vrot.lane.b32.xlu0 %v338_v2, %s293_s19  ;;  %77 = vrot.lane.b32.xlu1 %v343_v3, %s293_s19  ;;  %v276_v19 = vpack.c.bf16 %v145_v16, %v143_v15  ;;  %v144_v21 = vld [vmem:[%s471_s3 + $0x30] sm:$0xff]  ;;  %v147_v22 = vld [vmem:[%s471_s3 + $0x48] sm:$0xff] }
   0x7   :  { %v22_v25 = vld [vmem:[%s470_s1 + $0x18] sm:$0xff]  ;;  %273 = vmatprep.subr.bf16.mxu0 %v272_v13  ;;  %284 = vmatprep.subr.bf16.mxu1 %v272_v13  ;;  %v278_v28 = vpack.c.bf16 %v144_v21, %v142_v20  ;;  %v146_v30 = vld [vmem:[%s471_s3 + $0x40] sm:$0xff]  ;;  %v148_v31 = vld [vmem:[%s471_s3 + $0x50] sm:$0xff] }
   0x8   :  { %v149_v26 = vld [vmem:[%s471_s3 + $0x58] sm:$0xff]  ;;  %275 = vmatpush1.bf16.msra.mxu0 %v274_v18  ;;  %287 = vmatpush1.bf16.msra.mxu1 %v274_v18  ;;  %v282_v34 = vpack.c.bf16 %v148_v31, %v146_v30  ;;  %v30_v37 = vmul.f32 %v343_v3, %v22_v25 }
   0x9   :  { %277 = vmatprep.subr.bf16.mxu0 %v276_v19  ;;  %285 = vmatprep.subr.bf16.mxu1 %v276_v19  ;;  %v280_v29 = vpack.c.bf16 %v149_v26, %v147_v22 }
   0xa   :  { %55 = vrot.lane.b32.xlu0 %v324_v0, %s294_s24  ;;  %59 = vrot.lane.b32.xlu1 %v338_v2, %s294_s24 }
   0xc   :  { %279 = vmatpush1.bf16.msra.mxu0 %v278_v28  ;;  %288 = vmatpush1.bf16.msra.mxu1 %v278_v28 }
   0xd   :  { %281 = vmatprep.subr.bf16.mxu0 %v280_v29  ;;  %286 = vmatprep.subr.bf16.mxu1 %v280_v29 }
   0xe   :  { %57 = vrot.lane.b32.xlu0 %v329_v1, %s294_s24  ;;  %61 = vrot.lane.b32.xlu1 %v343_v3, %s294_s24 }
  0x10   :  { %283 = vmatpush1.bf16.msra.mxu0 %v282_v34  ;;  %289 = vmatpush1.bf16.msra.mxu1 %v282_v34 }
  0x74   :  { %v72_v5 = vpop.permute.xlu0 %71  ;;  %v74_v6 = vpop.permute.xlu1 %73 }
  0x75   :  { %v83_v9 = vmul.f32 %v72_v5, %v19_v4  ;;  %v84_v17 = vmul.f32 %v74_v6, %v363_v7  ;;  %v110_v5 = vmul.f32 %v107_v58, %v338_v2 }
  0x77   :  { %91 = vrot.lane.b32.xlu0 %v83_v9, %s294_s24 }
  0x78   :  { %v76_v23 = vpop.permute.xlu0 %75  ;;  %v78_v24 = vpop.permute.xlu1 %77 }
  0x79   :  { %v85_v27 = vmul.f32 %v76_v23, %v21_v8  ;;  %v86_v32 = vmul.f32 %v78_v24, %v22_v25 }
  0x7b   :  { %95 = vrot.lane.b32.xlu1 %v85_v27, %s294_s24  ;;  %93 = vrot.lane.b32.xlu0 %v84_v17, %s294_s24 }
  0x7c   :  { %v56_v38 = vpop.permute.xlu0 %55  ;;  %v60_v40 = vpop.permute.xlu1 %59 }
  0x7d   :  { %v67_v43 = vmul.f32 %v56_v38, %v19_v4  ;;  %v69_v46 = vmul.f32 %v60_v40, %v21_v8  ;;  %v109_v4 = vmul.f32 %v107_v58, %v329_v1 }
  0x7f   :  { %97 = vrot.lane.b32.xlu1 %v86_v32, %s294_s24  ;;  %35 = vrot.lane.b32.xlu0 %v27_v33, %s294_s24 }
  0x80   :  { %v58_v41 = vpop.permute.xlu0 %57  ;;  %v62_v42 = vpop.permute.xlu1 %61 }
  0x81   :  { %v68_v47 = vmul.f32 %v58_v41, %v363_v7  ;;  %v70_v52 = vmul.f32 %v62_v42, %v22_v25 }
  0x83   :  { %39 = vrot.lane.b32.xlu1 %v29_v35, %s294_s24  ;;  %37 = vrot.lane.b32.xlu0 %v28_v36, %s294_s24 }
  0x87   :  { %41 = vrot.lane.b32.xlu1 %v30_v37, %s294_s24 }
  0xe9   :  { %v92_v44 = vpop.permute.xlu0 %91 }
  0xea   :  { %v103_v45 = vadd.f32 %v92_v44, %v67_v43 }
  0xec   :  { %116 = vrot.lane.b32.xlu0 %v103_v45, %s293_s19 }
  0xed   :  { %v96_v48 = vpop.permute.xlu1 %95  ;;  %v94_v49 = vpop.permute.xlu0 %93 }
  0xee   :  { %v105_v50 = vadd.f32 %v96_v48, %v69_v46  ;;  %v104_v51 = vadd.f32 %v94_v49, %v68_v47 }
  0xf0   :  { %120 = vrot.lane.b32.xlu1 %v105_v50, %s293_s19  ;;  %118 = vrot.lane.b32.xlu0 %v104_v51, %s293_s19 }
  0xf1   :  { %v98_v53 = vpop.permute.xlu1 %97  ;;  %v36_v55 = vpop.permute.xlu0 %35 }
  0xf2   :  { %v106_v54 = vadd.f32 %v98_v53, %v70_v52  ;;  %v47_v61 = vsub.f32 %v27_v33, %v36_v55 }
  0xf4   :  { %122 = vrot.lane.b32.xlu1 %v106_v54, %s293_s19 }
  0xf5   :  { %v40_v56 = vpop.permute.xlu1 %39  ;;  %v38_v57 = vpop.permute.xlu0 %37 }
  0xf6   :  { %v49_v7 = vsub.f32 %v29_v35, %v40_v56  ;;  %v48_v8 = vsub.f32 %v28_v36, %v38_v57 }
  0xf9   :  { %v42_v60 = vpop.permute.xlu1 %41 }
  0xfa   :  { %v50_v2 = vsub.f32 %v30_v37, %v42_v60 }
 0x15e   :  { %v117_v62 = vpop.permute.xlu0 %116 }
 0x15f   :  { %v129_v63 = vsel %vm128_vm0, %v47_v61, %v117_v62 }
 0x160   :  { %v134_v6 = vsel %vm133_vm1, %v129_v63, %v108_v59 }
 0x161   :  { %268 = vmatmul.mubr.msk.f32.vlgmr.msra.gmra.mrb[0].mxu0 %vm150_vm2, %v134_v6 }
 0x162   :  { %v121_v9 = vpop.permute.xlu1 %120  ;;  %v119_v0 = vpop.permute.xlu0 %118  ;;  %233 = vmatprep.mubr.f32.mxu0 %v295_v39 }
 0x163   :  { %v131_v10 = vsel %vm128_vm0, %v49_v7, %v121_v9  ;;  %v130_v11 = vsel %vm128_vm0, %v48_v8, %v119_v0 }
 0x164   :  { %v135_v13 = vsel %vm133_vm1, %v130_v11, %v109_v4  ;;  %v136_v1 = vsel %vm133_vm1, %v131_v10, %v110_v5 }
 0x165   :  { %269 = vmatmul.mubr.msk.f32.gmra.mrb[2].mxu0 %vm150_vm2, %v135_v13  ;;  %270 = vmatmul.mubr.msk.f32.vlgmr.msra.gmra.mrb[0].mxu1 %vm150_vm2, %v136_v1 }
 0x166   :  { %v123_v14 = vpop.permute.xlu1 %122  ;;  %245 = vmatprep.mubr.f32.mxu1 %v295_v39 }
 0x167   :  { %v132_v15 = vsel %vm128_vm0, %v50_v2, %v123_v14 }
 0x168   :  { %v137_v16 = vsel %vm133_vm1, %v132_v15, %v111_v12 }
 0x169   :  { %271 = vmatmul.mubr.msk.f32.gmra.mrb[2].mxu1 %vm150_vm2, %v137_v16 }
 0x234   :  { %v229_v17 = vpop.f32.mrb[0].mxu0 }
 0x235   :  { %252 = vst [vmem:[%s473_s4] sm:$0xff] %v229_v17  ;;  %v231_v3 = vpop.f32.mrb[1].mxu0 }
 0x236   :  { %v256_v18 = vmax.f32 %v231_v3, 0.0 }
 0x238   :  { %260 = vst [vmem:[%s473_s4 + $0x8] sm:$0xff] %v256_v18  ;;  %v235_v19 = vpop.f32.mrb[2].mxu0  ;;  %v241_v20 = vpop.f32.mrb[0].mxu1 }
 0x239   :  { %253 = vst [vmem:[%s473_s4 + $0x10] sm:$0xff] %v235_v19  ;;  %254 = vst [vmem:[%s473_s4 + $0x20] sm:$0xff] %v241_v20  ;;  %v237_v21 = vpop.f32.mrb[3].mxu0  ;;  %v243_v22 = vpop.f32.mrb[1].mxu1 }
 0x23a   :  { %v257_v23 = vmax.f32 %v237_v21, 0.0  ;;  %v258_v24 = vmax.f32 %v243_v22, 0.0 }
 0x23c   :  { %261 = vst [vmem:[%s473_s4 + $0x18] sm:$0xff] %v257_v23  ;;  %262 = vst [vmem:[%s473_s4 + $0x28] sm:$0xff] %v258_v24  ;;  %v247_v25 = vpop.f32.mrb[2].mxu1 }
 0x23d   :  { %255 = vst [vmem:[%s473_s4 + $0x30] sm:$0xff] %v247_v25  ;;  %v249_v26 = vpop.f32.mrb[3].mxu1 }
 0x23e   :  { %v259_v27 = vmax.f32 %v249_v26, 0.0 }
 0x240   :  { %263 = vst [vmem:[%s473_s4 + $0x38] sm:$0xff] %v259_v27 }

</bundles_post_ra>
